<compile_context>
chip_gen: v7x
topology: tpu7x:2x2x1
jax: 0.10.0
libtpu: 0.0.40
codegen_flags: <defaults>
</compile_context>

<pallas_src>
import math

import jax
import jax.numpy as jnp
from jax.experimental import pallas as pl
from jax.experimental.pallas import tpu as pltpu


_LANES = 128
# Per-stream, per-buffer tile target: 4 MiB.  Streamed path: 3 streams x 2
# buffers x 4 MiB = 24 MiB; gather path: 2 x 2 x 4 MiB = 16 MiB.  Both fit
# comfortably under the 48 MiB limit and v7x's 64 MiB physical VMEM while being
# far above the size where the ~0.35us/step overhead matters.
# (v5e/v6e with 128 MiB VMEM could raise this to 8-16 MiB; 4 MiB is the
# generation-safe choice.)
_TARGET_BLOCK_BYTES = 4 * 1024 * 1024
_VMEM_LIMIT_BYTES = 48 * 1024 * 1024


def _round_up(a: int, b: int) -> int:
    return (a + b - 1) // b * b


def _pick_feature_chunk(total_sublanes: int, bytes_per_sublane: int,
                        target_bytes: int) -> int:
    """Sublane chunk S: full extent if it fits the byte target, else the largest
    multiple of 8 under the target.  Ragged tails are handled by a cdiv grid
    (Pallas masks the partial last block), so S need not divide total_sublanes."""
    s = target_bytes // bytes_per_sublane
    if s >= total_sublanes:
        return total_sublanes            # full extent is always a legal block dim
    return max(8, (s // 8) * 8)


def _mixup_gather_kernel(idx_ref, lam_ref, x_ref, o_ref):
    """Block = (B, S, 128): all batch rows of one feature chunk.  The batch
    gather happens in VMEM, so x is read from HBM exactly once."""
    batch = x_ref.shape[0]
    lam = lam_ref[0]                      # f32 scalar from SMEM, loop-invariant
    one_minus = 1.0 - lam

    def body(i, carry):
        xi = x_ref[i].astype(jnp.float32)             # (S, 128)
        xs = x_ref[idx_ref[i]].astype(jnp.float32)    # gathered row, (S, 128)
        o_ref[i] = (lam * xi + one_minus * xs).astype(o_ref.dtype)
        return carry

    # Short fixed trip-count -> unroll for LLO visibility when batch is tiny.
    jax.lax.fori_loop(0, batch, body, 0, unroll=batch <= 8)


def _mixup_streamed_kernel(idx_ref, lam_ref, x_ref, xs_ref, o_ref):
    """Block = (S, 128) of one batch row; the shuffled row arrives via the
    pipeline (its BlockSpec index_map reads the prefetched permutation)."""
    del idx_ref                           # consumed only by the index_maps
    lam = lam_ref[0]
    one_minus = 1.0 - lam
    # Upcast once, lerp in f32, downcast once (no-op for f32 inputs; keeps v5e,
    # which has no bf16 VALU, on the fast path).
    x = x_ref[...].astype(jnp.float32)
    xs = xs_ref[...].astype(jnp.float32)
    o_ref[...] = (lam * x + one_minus * xs).astype(o_ref.dtype)


def mixup_pallas(x, y, idx, lam, *, gather_in_vmem=None):
    """Mixup forward (manifold_mixup=True, training) with Pallas TPU kernels.

    x:   [B, ...] float array (any trailing feature dims)
    y:   [B, NUM_CLASSES] float array (soft / one-hot labels)
    idx: [B] int32 permutation
    lam: scalar in [0, 1]
    Returns (x_mixup, y_mixup) with the same shapes/dtypes as (x, y).
    """
    orig_shape = x.shape
    B = orig_shape[0]
    F = math.prod(orig_shape[1:])
    itemsize = jnp.dtype(x.dtype).itemsize

    # Lane-dense view: pad features to a multiple of 128 (instead of asserting).
    Fp = _round_up(max(F, _LANES), _LANES)
    SL = Fp // _LANES
    x2 = x.reshape(B, F)
    if Fp != F:
        x2 = jnp.pad(x2, ((0, 0), (0, Fp - F)))
    x3 = x2.reshape(B, SL, _LANES)

    lam_f32 = jnp.asarray(lam, jnp.float32)
    lam_arr = lam_f32.reshape(1)
    idx = idx.astype(jnp.int32)

    lam_spec = pl.BlockSpec(memory_space=pltpu.MemorySpace.SMEM)

    if gather_in_vmem is None:
        # Auto: use the in-VMEM gather whenever the smallest legal block
        # (all B rows x 8 sublanes) fits the per-buffer byte target.
        gather_in_vmem = (B * 8 * _LANES * itemsize) <= _TARGET_BLOCK_BYTES

    if gather_in_vmem:
        # --- Path 1: in-VMEM batch gather, 2N HBM traffic -------------------
        S = _pick_feature_chunk(SL, B * _LANES * itemsize, _TARGET_BLOCK_BYTES)
        n_chunks = pl.cdiv(SL, S)
        grid_spec = pltpu.PrefetchScalarGridSpec(
            num_scalar_prefetch=1,
            grid=(n_chunks,),
            in_specs=[
                lam_spec,
                pl.BlockSpec((B, S, _LANES), lambda j, idx_sm: (0, j, 0)),
            ],
            out_specs=pl.BlockSpec((B, S, _LANES), lambda j, idx_sm: (0, j, 0)),
        )
        x_mix3 = pl.pallas_call(
            _mixup_gather_kernel,
            grid_spec=grid_spec,
            out_shape=jax.ShapeDtypeStruct((B, SL, _LANES), x.dtype),
            compiler_params=pltpu.CompilerParams(
                dimension_semantics=("parallel",),
                vmem_limit_bytes=_VMEM_LIMIT_BYTES,
            ),
        )(idx, lam_arr, x3)
    else:
        # --- Path 2: streamed, pipeline-driven gather (very large batch) ----
        S = _pick_feature_chunk(SL, _LANES * itemsize, _TARGET_BLOCK_BYTES)
        n_chunks = pl.cdiv(SL, S)
        x_spec = pl.BlockSpec((pl.Squeezed(), S, _LANES),
                              lambda i, j, idx_sm: (i, j, 0))
        xs_spec = pl.BlockSpec((pl.Squeezed(), S, _LANES),
                               lambda i, j, idx_sm: (idx_sm[i], j, 0))
        o_spec = pl.BlockSpec((pl.Squeezed(), S, _LANES),
                              lambda i, j, idx_sm: (i, j, 0))
        grid_spec = pltpu.PrefetchScalarGridSpec(
            num_scalar_prefetch=1,
            grid=(B, n_chunks),
            in_specs=[lam_spec, x_spec, xs_spec],
            out_specs=o_spec,
        )
        x_mix3 = pl.pallas_call(
            _mixup_streamed_kernel,
            grid_spec=grid_spec,
            out_shape=jax.ShapeDtypeStruct((B, SL, _LANES), x.dtype),
            compiler_params=pltpu.CompilerParams(
                dimension_semantics=("parallel", "parallel"),
                vmem_limit_bytes=_VMEM_LIMIT_BYTES,
            ),
        )(idx, lam_arr, x3, x3)

    x_mix = x_mix3.reshape(B, Fp)
    if Fp != F:
        x_mix = x_mix[:, :F]
    x_mix = x_mix.reshape(orig_shape)

    # y is only [B, NUM_CLASSES] (a few KB): plain-JAX lerp rather than extra
    # tiny sub-128-lane DMAs + masked stores per grid step.
    y_mix = (lam_f32 * y.astype(jnp.float32)
             + (1.0 - lam_f32) * y[idx].astype(jnp.float32)).astype(y.dtype)

    return x_mix, y_mix


if __name__ == "__main__":
    key = jax.random.PRNGKey(0)
    k_x, k_y, k_lam, k_perm = jax.random.split(key, 4)

    B, C, H, W = 2, 4, 16, 16
    NUM_CLASSES = 10
    ALPHA = 1.0

    x = jax.random.normal(k_x, (B, C, H, W), dtype=jnp.float32)
    labels = jax.random.randint(k_y, (B,), 0, NUM_CLASSES)
    y = jax.nn.one_hot(labels, NUM_CLASSES, dtype=jnp.float32)

    # RNG for mixup (lam ~ Beta(alpha, alpha), idx = permutation) — plain JAX,
    # mirroring np.random.* in the reference module.
    lam = jax.random.beta(k_lam, ALPHA, ALPHA)
    idx = jax.random.permutation(k_perm, B).astype(jnp.int32)

    # Default (in-VMEM gather) path.
    x_mix, y_mix = mixup_pallas(x, y, idx, lam)
    # Also exercise the streamed / pipeline-gather path.
    x_mix_s, y_mix_s = mixup_pallas(x, y, idx, lam, gather_in_vmem=False)
    jax.block_until_ready((x_mix, y_mix, x_mix_s, y_mix_s))

    # Reference check against the PyTorch-module semantics.
    x_ref = lam * x + (1.0 - lam) * x[idx]
    y_ref = lam * y + (1.0 - lam) * y[idx]
    assert jnp.allclose(x_mix, x_ref, atol=1e-6)
    assert jnp.allclose(y_mix, y_ref, atol=1e-6)
    assert jnp.allclose(x_mix_s, x_ref, atol=1e-6)
    assert jnp.allclose(y_mix_s, y_ref, atol=1e-6)

    print("KERNEL_OK")
</pallas_src>

<mosaic_0001>
module attributes {stable_mosaic.version = 11 : i64} {
  func.func @_mixup_gather_kernel(%arg0: i32, %arg1: memref<2xi32, #tpu.memory_space<smem>>, %arg2: memref<1xf32, #tpu.memory_space<smem>>, %arg3: memref<2x8x128xf32, #tpu.memory_space<vmem>>, %arg4: memref<2x8x128xf32, #tpu.memory_space<vmem>>) attributes {dimension_semantics = [#tpu.dimension_semantics<parallel>], iteration_bounds = array<i64: 1>, scalar_prefetch = 1 : i64, scratch_operands = 0 : i64, tpu.core_type = #tpu.core_type<tc>, window_params = [{transform_indices = @transform_0, window_bounds = array<i64: 1>}, {transform_indices = @transform_1, window_bounds = array<i64: 2, 8, 128>}, {transform_indices = @transform_2, window_bounds = array<i64: 2, 8, 128>}]} {
    %c0 = arith.constant 0 : index
    %0 = memref.load %arg2[%c0] : memref<1xf32, #tpu.memory_space<smem>>
    %cst = arith.constant 1.000000e+00 : f32
    %1 = arith.subf %cst, %0 : f32
    %c0_i32 = arith.constant 0 : i32
    %2 = arith.index_cast %c0_i32 : i32 to index
    %c0_0 = arith.constant 0 : index
    %c0_1 = arith.constant 0 : index
    %3 = vector.load %arg3[%2, %c0_0, %c0_1] : memref<2x8x128xf32, #tpu.memory_space<vmem>>, vector<1x8x128xf32>
    %4 = vector.shape_cast %3 : vector<1x8x128xf32> to vector<8x128xf32>
    %5 = arith.index_cast %c0_i32 : i32 to index
    %6 = memref.load %arg1[%5] : memref<2xi32, #tpu.memory_space<smem>>
    %7 = arith.index_cast %6 : i32 to index
    %c0_2 = arith.constant 0 : index
    %c0_3 = arith.constant 0 : index
    %8 = vector.load %arg3[%7, %c0_2, %c0_3] : memref<2x8x128xf32, #tpu.memory_space<vmem>>, vector<1x8x128xf32>
    %9 = vector.shape_cast %8 : vector<1x8x128xf32> to vector<8x128xf32>
    %10 = vector.broadcast %0 : f32 to vector<8x128xf32>
    %11 = arith.mulf %10, %4 : vector<8x128xf32>
    %12 = vector.broadcast %1 : f32 to vector<8x128xf32>
    %13 = arith.mulf %12, %9 : vector<8x128xf32>
    %14 = arith.addf %11, %13 : vector<8x128xf32>
    %15 = arith.index_cast %c0_i32 : i32 to index
    %c0_4 = arith.constant 0 : index
    %c0_5 = arith.constant 0 : index
    %16 = vector.load %arg4[%15, %c0_4, %c0_5] : memref<2x8x128xf32, #tpu.memory_space<vmem>>, vector<1x8x128xf32>
    %17 = vector.shape_cast %16 : vector<1x8x128xf32> to vector<8x128xf32>
    %18 = vector.shape_cast %14 : vector<8x128xf32> to vector<1x8x128xf32>
    tpu.vector_store %arg4[%15, %c0_4, %c0_5], %18 {strides = array<i32>} : memref<2x8x128xf32, #tpu.memory_space<vmem>>, vector<1x8x128xf32>,
    %c1_i32 = arith.constant 1 : i32
    %19 = arith.index_cast %c1_i32 : i32 to index
    %c0_6 = arith.constant 0 : index
    %c0_7 = arith.constant 0 : index
    %20 = vector.load %arg3[%19, %c0_6, %c0_7] : memref<2x8x128xf32, #tpu.memory_space<vmem>>, vector<1x8x128xf32>
    %21 = vector.shape_cast %20 : vector<1x8x128xf32> to vector<8x128xf32>
    %22 = arith.index_cast %c1_i32 : i32 to index
    %23 = memref.load %arg1[%22] : memref<2xi32, #tpu.memory_space<smem>>
    %24 = arith.index_cast %23 : i32 to index
    %c0_8 = arith.constant 0 : index
    %c0_9 = arith.constant 0 : index
    %25 = vector.load %arg3[%24, %c0_8, %c0_9] : memref<2x8x128xf32, #tpu.memory_space<vmem>>, vector<1x8x128xf32>
    %26 = vector.shape_cast %25 : vector<1x8x128xf32> to vector<8x128xf32>
    %27 = vector.broadcast %0 : f32 to vector<8x128xf32>
    %28 = arith.mulf %27, %21 : vector<8x128xf32>
    %29 = vector.broadcast %1 : f32 to vector<8x128xf32>
    %30 = arith.mulf %29, %26 : vector<8x128xf32>
    %31 = arith.addf %28, %30 : vector<8x128xf32>
    %32 = arith.index_cast %c1_i32 : i32 to index
    %c0_10 = arith.constant 0 : index
    %c0_11 = arith.constant 0 : index
    %33 = vector.load %arg4[%32, %c0_10, %c0_11] : memref<2x8x128xf32, #tpu.memory_space<vmem>>, vector<1x8x128xf32>
    %34 = vector.shape_cast %33 : vector<1x8x128xf32> to vector<8x128xf32>
    %35 = vector.shape_cast %31 : vector<8x128xf32> to vector<1x8x128xf32>
    tpu.vector_store %arg4[%32, %c0_10, %c0_11], %35 {strides = array<i32>} : memref<2x8x128xf32, #tpu.memory_space<vmem>>, vector<1x8x128xf32>,
    %c2_i32 = arith.constant 2 : i32
    return
  }
  func.func @transform_0(%arg0: i32, %arg1: memref<2xi32, #tpu.memory_space<smem>>) -> i32 {
    %c0_i32 = arith.constant 0 : i32
    %c0_i32_0 = arith.constant 0 : i32
    return %c0_i32 : i32
  }
  func.func @transform_1(%arg0: i32, %arg1: memref<2xi32, #tpu.memory_space<smem>>) -> (i32, i32, i32) {
    %c0_i32 = arith.constant 0 : i32
    %c0_i32_0 = arith.constant 0 : i32
    %c0_i32_1 = arith.constant 0 : i32
    return %c0_i32, %arg0, %c0_i32_0 : i32, i32, i32
  }
  func.func @transform_2(%arg0: i32, %arg1: memref<2xi32, #tpu.memory_space<smem>>) -> (i32, i32, i32) {
    %c0_i32 = arith.constant 0 : i32
    %c0_i32_0 = arith.constant 0 : i32
    %c0_i32_1 = arith.constant 0 : i32
    return %c0_i32, %arg0, %c0_i32_0 : i32, i32, i32
  }
}

</mosaic_0001>

<bundles_post_ra>
// kernel: tpu_custom_call.1
= control target key start
LH: loop header
LB: loop body
LE: loop exit
PB: predicated region body
PF: predicated region fallthrough
CT: control target
= control target key end

     0   :  { %s213_s0 = inlined_call_operand.vmem [shape: s32[2], index: 0, kind: input, shape index: {}]   ;;  %s214_s1 = inlined_call_operand.<no memory space> [shape: f32[1], index: 1, kind: input, shape index: {}]   ;;  %s215_s2 = inlined_call_operand.hbm [shape: f32[2,8,128], index: 2, kind: input, shape index: {}]   ;;  %s216_s3 = inlined_call_operand.hbm [shape: f32[2,8,128], index: 3, kind: output, shape index: {}]  }
   0x1   :  { %s8_s14 = sshll.u32 %s213_s0, 4  ;;  %s9_s14 = int_to_ptr.vmem [resolvable:$true] %s8_s14 }
   0x2   :  { %s87_s15 = scalar_lea.vmem %s9_s14, 16  ;;  %p92_p1 = scmp.lt.s32.totalorder %s9_s14, %s9_s14 }
   0x3   :  { %p88_p0 = scmp.ne.s32.totalorder %s9_s14, %s87_s15  ;;  %p93_p2 = scmp.lt.s32.totalorder %s87_s15, %s87_s15 }
   0x5   :  { %p94_p3 = por %p93_p2, %p92_p1 }
   0x7   :  { %p95_p4 = pnand %p94_p3, %p88_p0 }
   0x9   :  { %98 = shalt.err (!%p95_p4)  }
   0xa   :  { %s149_s16 = smov [#allocation3]  }
   0xb   :  { %11 = dma.vmem_to_smem %s9_s14, 16, %s149_s16, [#allocation2] }
   0xc   :  { %143 = dma.done.wait [#allocation2], 16 }
   0xd   :  { %144 = vsyncadd [#allocation2], 4294967280 }
   0xe   :  { %14 = sfence }
   0xf   :  { %15 = vsyncpa [#allocation6], 0 }
  0x10   :  { %16 = vsyncpa [#allocation7], 0  ;;  %s150_s17 = smov [#allocation5]   ;;  %s99_s20 = scalar_lea.hbm %s215_s2, 256 }
  0x11   :  { %s24_s18 = sshll.u32 %s150_s17, 4  ;;  %p100_p5 = scmp.ne.s32.totalorder %s215_s2, %s99_s20  ;;  %s25_s18 = int_to_ptr.vmem [resolvable:$true] %s24_s18 }
  0x12   :  { %p103_p6 = scmp.lt.u32.totalorder %s99_s20, %s215_s2 }
  0x14   :  { %p105_p7 = pnand %p103_p6, %p100_p5 }
  0x16   :  { %108 = shalt.err (!%p105_p7)
}
  0x17   :  { %s109_s25 = scalar_lea.vmem %s25_s18, 256  ;;  %p114_p9 = scmp.lt.s32.totalorder %s25_s18, %s25_s18 }
  0x18   :  { %p110_p8 = scmp.ne.s32.totalorder %s25_s18, %s109_s25  ;;  %p115_p10 = scmp.lt.s32.totalorder %s109_s25, %s109_s25 }
  0x1a   :  { %p116_p11 = por %p115_p10, %p114_p9 }
  0x1c   :  { %p117_p12 = pnand %p116_p11, %p110_p8 }
  0x1e   :  { %120 = shalt.err (!%p117_p12)
}
  0x1f   :  { %s151_s26 = smov 128   ;;  %s152_s27 = smov 8  }
  0x20   :  { %30 = dma.hbm_to_vmem [thread:$0]  %s215_s2, 256, %s25_s18, [#allocation6], %s151_s26, %s151_s26, %s152_s27  }
  0x21   :  { %145 = dma.done.wait [#allocation6], 256  }
  0x22   :  { %146 = vsyncadd [#allocation6], 4294967040  ;;  %s37_s30 = sld [smem:[#allocation3]]  ;;  %s80_s4 = sld [smem:[#allocation3 + $0x1]]  ;;  %v41_v0 = vstv %s214_s1  ;;  %v36_v1 = vld [vmem:[#allocation5] sm:$0xff]  ;;  %v48_v3 = vld [vmem:[#allocation5 + $0x8] sm:$0xff] }
  0x23   :  { %s35_s7 = ssub.f32 1.0, %s214_s1  ;;  %v42_v4 = vmul.f32 %v41_v0, %v36_v1  ;;  %v53_v5 = vmul.f32 %v48_v3, %v41_v0  ;;  %s153_s13 = smov [#allocation8]  }
  0x24   :  { %s63_s14 = sshll.u32 %s153_s13, 4  ;;  %s64_s14 = int_to_ptr.vmem [resolvable:$true] %s63_s14 }
  0x25   :  { %v43_v2 = vstv %s35_s7  ;;  %s121_s1 = scalar_lea.vmem %s64_s14, 256  ;;  %p126_p0 = scmp.lt.s32.totalorder %s64_s14, %s64_s14 }
  0x26   :  { %p122_p13 = scmp.ne.s32.totalorder %s64_s14, %s121_s1  ;;  %p127_p1 = scmp.lt.s32.totalorder %s121_s1, %s121_s1 }
  0x28   :  { %s79_s10 = sshll.u32 %s37_s30, 3  ;;  %s81_s11 = sshll.u32 %s80_s4, 3 }
  0x29   :  { %s39_s2 = scalar_lea.vmem [#allocation5], %s79_s10  ;;  %s51_s12 = scalar_lea.vmem [#allocation5], %s81_s11 }
  0x2a   :  { %v40_v6 = vld [vmem:[%s39_s2] sm:$0xff]  ;;  %p128_p2 = por %p127_p1, %p126_p0 }
  0x2b   :  { %v52_v7 = vld [vmem:[%s51_s12] sm:$0xff]  ;;  %v44_v8 = vmul.f32 %v43_v2, %v40_v6 }
  0x2c   :  { %v54_v9 = vmul.f32 %v52_v7, %v43_v2  ;;  %p129_p3 = pnand %p128_p2, %p122_p13 }
  0x2d   :  { %v45_v10 = vadd.f32 %v44_v8, %v42_v4 }
  0x2e   :  { %v55_v11 = vadd.f32 %v54_v9, %v53_v5 }
  0x2f   :  { %46 = vst [vmem:[#allocation8] sm:$0xff] %v45_v10 }
  0x30   :  { %57 = vst [vmem:[#allocation8 + $0x8] sm:$0xff] %v55_v11 }
  0x31   :  { %132 = shalt.err (!%p129_p3)
}
  0x32   :  { %s133_s17 = scalar_lea.hbm %s216_s3, 256 }
  0x33   :  { %p134_p4 = scmp.ne.s32.totalorder %s216_s3, %s133_s17  ;;  %p137_p5 = scmp.lt.u32.totalorder %s133_s17, %s216_s3 }
  0x35   :  { %p139_p6 = pnand %p137_p5, %p134_p4 }
  0x37   :  { %142 = shalt.err (!%p139_p6)
}
  0x38   :  { %69 = dma.vmem_to_hbm [thread:$0]  %s64_s14, 256, %s216_s3, [#allocation7], %s151_s26, %s151_s26, %s152_s27  }
  0x39   :  { %147 = dma.done.wait [#allocation7], 256  }
  0x3a   :  { %148 = vsyncadd [#allocation7], 4294967040 }
  0x3b   :  { %73 = vsyncpa [#allocation6], 1 }
  0x3c   :  { %74 = vsyncpa [#allocation7], 1 }

</bundles_post_ra>
